<compile_context>
chip_gen: v7x
topology: tpu7x:2x2x1
jax: 0.10.0
libtpu: 0.0.40
codegen_flags: <defaults>
</compile_context>

<pallas_src>
import numpy as np
import jax
import jax.numpy as jnp
from jax.experimental import pallas as pl
from jax.experimental.pallas import tpu as pltpu


def _make_upsample_kernel(d, D, id_d_np):
    # For every input depth plane k, the (static) list of output planes it feeds.
    planes_for_k = [[int(p) for p in np.nonzero(id_d_np == k)[0]] for k in range(d)]

    def kernel(x_ref, s_ref, o_ref):
        # x_ref: (Bnc, d, h*w)   coarse slabs (lane-dense h*w)
        # s_ref: (h*w, H*W)      one-hot column selector (H & W selection merged)
        # o_ref: (Bnc, D, H*W)   upsampled slabs (lane-dense H*W)
        s = s_ref[...]  # hoisted: loaded once per grid step
        for k in range(d):
            outs = planes_for_k[k]
            if not outs:
                continue  # (only possible when downsampling)
            xk = x_ref[:, k, :]                                    # (Bnc, h*w), static slice
            yk = jnp.dot(xk, s, preferred_element_type=jnp.float32)  # (Bnc, H*W)
            yk = yk.astype(o_ref.dtype)
            for p in outs:          # depth replication = pure stores, zero MXU work
                o_ref[:, p, :] = yk
    return kernel


def _pick_bnc(nc, out_slab_bytes, max_block_bytes=4 * 1024 * 1024):
    """Largest divisor of nc whose output block fits the byte budget; prefer >=2 blocks."""
    cap = max(1, max_block_bytes // max(1, out_slab_bytes))
    divisors = [b for b in range(1, nc + 1) if nc % b == 0]
    fitting = [b for b in divisors if b <= cap] or [1]
    bnc = max(fitting)
    if nc // bnc < 2:  # give megacore (v7x: 2 TCs) at least 2 grid blocks when possible
        smaller = [b for b in fitting if nc // b >= 2]
        if smaller:
            bnc = max(smaller)
    return bnc


def upsample_3d_pallas(encoder_features, x):
    """Nearest 3D upsample of x to encoder_features' spatial size. NCDHW layout."""
    N, C, d, h, w = x.shape
    D, H, W = encoder_features.shape[2:]

    if (d, h, w) == (D, H, W):
        return x

    # PyTorch 'nearest' index rule: src = floor(dst * in / out)
    id_d = np.arange(D) * d // D          # (D,)
    id_h = np.arange(H) * h // H          # (H,)
    id_w = np.arange(W) * w // W          # (W,)

    # Combined (height, width) column selector over flattened h*w -> H*W.
    col_src = (id_h[:, None] * w + id_w[None, :]).reshape(-1)          # (H*W,)
    sel_dtype = x.dtype if jnp.issubdtype(x.dtype, jnp.floating) else jnp.float32
    s_hw_t = jnp.asarray(
        np.arange(h * w)[:, None] == col_src[None, :], dtype=sel_dtype)  # (h*w, H*W)

    nc = N * C
    x_flat = x.reshape(nc, d, h * w)

    itemsize = jnp.dtype(x.dtype).itemsize
    bnc = _pick_bnc(nc, D * H * W * itemsize)
    num_blocks = nc // bnc

    kernel = _make_upsample_kernel(d, D, id_d)

    out_flat = pl.pallas_call(
        kernel,
        out_shape=jax.ShapeDtypeStruct((nc, D, H * W), x.dtype),
        grid_spec=pltpu.PrefetchScalarGridSpec(
            num_scalar_prefetch=0,
            grid=(num_blocks,),
            in_specs=[
                # last-two block dims are full array dims -> no (8,128) issues
                pl.BlockSpec((bnc, d, h * w), lambda i: (i, 0, 0)),
                pl.BlockSpec((h * w, H * W), lambda i: (0, 0)),  # constant -> fetched once
            ],
            out_specs=pl.BlockSpec((bnc, D, H * W), lambda i: (i, 0, 0)),
        ),
        compiler_params=pltpu.CompilerParams(
            dimension_semantics=("parallel",),
            vmem_limit_bytes=32 * 1024 * 1024,
        ),
    )(x_flat, s_hw_t)

    return out_flat.reshape(N, C, D, H, W)


if __name__ == "__main__":
    key = jax.random.PRNGKey(0)
    k1, k2 = jax.random.split(key)

    # Small shapes: x is the coarse feature map, encoder_features the fine one.
    N, C = 2, 4
    d, h, w = 4, 8, 8
    D, H, W = 8, 16, 16
    Ce = 6  # encoder channel count (only its spatial size matters)

    x = jax.random.normal(k1, (N, C, d, h, w), dtype=jnp.float32)
    encoder_features = jax.random.normal(k2, (N, Ce, D, H, W), dtype=jnp.float32)

    out = upsample_3d_pallas(encoder_features, x)
    out = jax.block_until_ready(out)

    # Reference: pure-JAX nearest upsample with the same index rule.
    rid_d = jnp.asarray(np.arange(D) * d // D)
    rid_h = jnp.asarray(np.arange(H) * h // H)
    rid_w = jnp.asarray(np.arange(W) * w // W)
    ref = x[:, :, rid_d][:, :, :, rid_h][:, :, :, :, rid_w]

    assert out.shape == (N, C, D, H, W), out.shape
    assert jnp.allclose(out, ref, atol=0.0, rtol=0.0), "mismatch vs reference"
    print("KERNEL_OK")
</pallas_src>

<mosaic_0001>
module attributes {stable_mosaic.version = 11 : i64} {
  func.func @kernel(%arg0: i32, %arg1: memref<4x4x64xf32, #tpu.memory_space<vmem>>, %arg2: memref<64x256xf32, #tpu.memory_space<vmem>>, %arg3: memref<4x8x256xf32, #tpu.memory_space<vmem>>) attributes {dimension_semantics = [#tpu.dimension_semantics<parallel>], iteration_bounds = array<i64: 2>, scalar_prefetch = 0 : i64, scratch_operands = 0 : i64, tpu.core_type = #tpu.core_type<tc>, window_params = [{transform_indices = @transform_0, window_bounds = array<i64: 4, 4, 64>}, {pipeline_mode = #tpu.pipeline_mode<synchronous>, transform_indices = @transform_1, window_bounds = array<i64: 64, 256>}, {transform_indices = @transform_2, window_bounds = array<i64: 4, 8, 256>}]} {
    %c0 = arith.constant 0 : index
    %c0_0 = arith.constant 0 : index
    %0 = vector.load %arg2[%c0, %c0_0] : memref<64x256xf32, #tpu.memory_space<vmem>>, vector<64x256xf32>
    %c0_1 = arith.constant 0 : index
    %c0_2 = arith.constant 0 : index
    %c0_3 = arith.constant 0 : index
    %1 = vector.load %arg1[%c0_1, %c0_2, %c0_3] : memref<4x4x64xf32, #tpu.memory_space<vmem>>, vector<4x1x64xf32>
    %2 = vector.shape_cast %1 : vector<4x1x64xf32> to vector<4x64xf32>
    %cst = arith.constant dense<0.000000e+00> : vector<4x256xf32>
    %3 = tpu.matmul %2, %0, %cst {dimension_numbers = #tpu.dot_dimension_numbers<[1], [0], [0], [1], [0, 0, 1, 1], [], []>} : vector<4x64xf32>, vector<64x256xf32>, vector<4x256xf32> -> vector<4x256xf32>
    %c0_4 = arith.constant 0 : index
    %c0_5 = arith.constant 0 : index
    %c0_6 = arith.constant 0 : index
    %4 = vector.load %arg3[%c0_4, %c0_5, %c0_6] : memref<4x8x256xf32, #tpu.memory_space<vmem>>, vector<4x1x256xf32>
    %5 = vector.shape_cast %4 : vector<4x1x256xf32> to vector<4x256xf32>
    %6 = vector.shape_cast %3 : vector<4x256xf32> to vector<4x1x256xf32>
    tpu.vector_store %arg3[%c0_4, %c0_5, %c0_6], %6 {strides = array<i32>} : memref<4x8x256xf32, #tpu.memory_space<vmem>>, vector<4x1x256xf32>,
    %c0_7 = arith.constant 0 : index
    %c1 = arith.constant 1 : index
    %c0_8 = arith.constant 0 : index
    %7 = vector.load %arg3[%c0_7, %c1, %c0_8] : memref<4x8x256xf32, #tpu.memory_space<vmem>>, vector<4x1x256xf32>
    %8 = vector.shape_cast %7 : vector<4x1x256xf32> to vector<4x256xf32>
    %9 = vector.shape_cast %3 : vector<4x256xf32> to vector<4x1x256xf32>
    tpu.vector_store %arg3[%c0_7, %c1, %c0_8], %9 {strides = array<i32>} : memref<4x8x256xf32, #tpu.memory_space<vmem>>, vector<4x1x256xf32>,
    %c0_9 = arith.constant 0 : index
    %c1_10 = arith.constant 1 : index
    %c0_11 = arith.constant 0 : index
    %10 = vector.load %arg1[%c0_9, %c1_10, %c0_11] : memref<4x4x64xf32, #tpu.memory_space<vmem>>, vector<4x1x64xf32>
    %11 = vector.shape_cast %10 : vector<4x1x64xf32> to vector<4x64xf32>
    %cst_12 = arith.constant dense<0.000000e+00> : vector<4x256xf32>
    %12 = tpu.matmul %11, %0, %cst_12 {dimension_numbers = #tpu.dot_dimension_numbers<[1], [0], [0], [1], [0, 0, 1, 1], [], []>} : vector<4x64xf32>, vector<64x256xf32>, vector<4x256xf32> -> vector<4x256xf32>
    %c0_13 = arith.constant 0 : index
    %c2 = arith.constant 2 : index
    %c0_14 = arith.constant 0 : index
    %13 = vector.load %arg3[%c0_13, %c2, %c0_14] : memref<4x8x256xf32, #tpu.memory_space<vmem>>, vector<4x1x256xf32>
    %14 = vector.shape_cast %13 : vector<4x1x256xf32> to vector<4x256xf32>
    %15 = vector.shape_cast %12 : vector<4x256xf32> to vector<4x1x256xf32>
    tpu.vector_store %arg3[%c0_13, %c2, %c0_14], %15 {strides = array<i32>} : memref<4x8x256xf32, #tpu.memory_space<vmem>>, vector<4x1x256xf32>,
    %c0_15 = arith.constant 0 : index
    %c3 = arith.constant 3 : index
    %c0_16 = arith.constant 0 : index
    %16 = vector.load %arg3[%c0_15, %c3, %c0_16] : memref<4x8x256xf32, #tpu.memory_space<vmem>>, vector<4x1x256xf32>
    %17 = vector.shape_cast %16 : vector<4x1x256xf32> to vector<4x256xf32>
    %18 = vector.shape_cast %12 : vector<4x256xf32> to vector<4x1x256xf32>
    tpu.vector_store %arg3[%c0_15, %c3, %c0_16], %18 {strides = array<i32>} : memref<4x8x256xf32, #tpu.memory_space<vmem>>, vector<4x1x256xf32>,
    %c0_17 = arith.constant 0 : index
    %c2_18 = arith.constant 2 : index
    %c0_19 = arith.constant 0 : index
    %19 = vector.load %arg1[%c0_17, %c2_18, %c0_19] : memref<4x4x64xf32, #tpu.memory_space<vmem>>, vector<4x1x64xf32>
    %20 = vector.shape_cast %19 : vector<4x1x64xf32> to vector<4x64xf32>
    %cst_20 = arith.constant dense<0.000000e+00> : vector<4x256xf32>
    %21 = tpu.matmul %20, %0, %cst_20 {dimension_numbers = #tpu.dot_dimension_numbers<[1], [0], [0], [1], [0, 0, 1, 1], [], []>} : vector<4x64xf32>, vector<64x256xf32>, vector<4x256xf32> -> vector<4x256xf32>
    %c0_21 = arith.constant 0 : index
    %c4 = arith.constant 4 : index
    %c0_22 = arith.constant 0 : index
    %22 = vector.load %arg3[%c0_21, %c4, %c0_22] : memref<4x8x256xf32, #tpu.memory_space<vmem>>, vector<4x1x256xf32>
    %23 = vector.shape_cast %22 : vector<4x1x256xf32> to vector<4x256xf32>
    %24 = vector.shape_cast %21 : vector<4x256xf32> to vector<4x1x256xf32>
    tpu.vector_store %arg3[%c0_21, %c4, %c0_22], %24 {strides = array<i32>} : memref<4x8x256xf32, #tpu.memory_space<vmem>>, vector<4x1x256xf32>,
    %c0_23 = arith.constant 0 : index
    %c5 = arith.constant 5 : index
    %c0_24 = arith.constant 0 : index
    %25 = vector.load %arg3[%c0_23, %c5, %c0_24] : memref<4x8x256xf32, #tpu.memory_space<vmem>>, vector<4x1x256xf32>
    %26 = vector.shape_cast %25 : vector<4x1x256xf32> to vector<4x256xf32>
    %27 = vector.shape_cast %21 : vector<4x256xf32> to vector<4x1x256xf32>
    tpu.vector_store %arg3[%c0_23, %c5, %c0_24], %27 {strides = array<i32>} : memref<4x8x256xf32, #tpu.memory_space<vmem>>, vector<4x1x256xf32>,
    %c0_25 = arith.constant 0 : index
    %c3_26 = arith.constant 3 : index
    %c0_27 = arith.constant 0 : index
    %28 = vector.load %arg1[%c0_25, %c3_26, %c0_27] : memref<4x4x64xf32, #tpu.memory_space<vmem>>, vector<4x1x64xf32>
    %29 = vector.shape_cast %28 : vector<4x1x64xf32> to vector<4x64xf32>
    %cst_28 = arith.constant dense<0.000000e+00> : vector<4x256xf32>
    %30 = tpu.matmul %29, %0, %cst_28 {dimension_numbers = #tpu.dot_dimension_numbers<[1], [0], [0], [1], [0, 0, 1, 1], [], []>} : vector<4x64xf32>, vector<64x256xf32>, vector<4x256xf32> -> vector<4x256xf32>
    %c0_29 = arith.constant 0 : index
    %c6 = arith.constant 6 : index
    %c0_30 = arith.constant 0 : index
    %31 = vector.load %arg3[%c0_29, %c6, %c0_30] : memref<4x8x256xf32, #tpu.memory_space<vmem>>, vector<4x1x256xf32>
    %32 = vector.shape_cast %31 : vector<4x1x256xf32> to vector<4x256xf32>
    %33 = vector.shape_cast %30 : vector<4x256xf32> to vector<4x1x256xf32>
    tpu.vector_store %arg3[%c0_29, %c6, %c0_30], %33 {strides = array<i32>} : memref<4x8x256xf32, #tpu.memory_space<vmem>>, vector<4x1x256xf32>,
    %c0_31 = arith.constant 0 : index
    %c7 = arith.constant 7 : index
    %c0_32 = arith.constant 0 : index
    %34 = vector.load %arg3[%c0_31, %c7, %c0_32] : memref<4x8x256xf32, #tpu.memory_space<vmem>>, vector<4x1x256xf32>
    %35 = vector.shape_cast %34 : vector<4x1x256xf32> to vector<4x256xf32>
    %36 = vector.shape_cast %30 : vector<4x256xf32> to vector<4x1x256xf32>
    tpu.vector_store %arg3[%c0_31, %c7, %c0_32], %36 {strides = array<i32>} : memref<4x8x256xf32, #tpu.memory_space<vmem>>, vector<4x1x256xf32>,
    return
  }
  func.func @transform_0(%arg0: i32) -> (i32, i32, i32) {
    %c0_i32 = arith.constant 0 : i32
    %c0_i32_0 = arith.constant 0 : i32
    %c0_i32_1 = arith.constant 0 : i32
    return %arg0, %c0_i32, %c0_i32_0 : i32, i32, i32
  }
  func.func @transform_1(%arg0: i32) -> (i32, i32) {
    %c0_i32 = arith.constant 0 : i32
    %c0_i32_0 = arith.constant 0 : i32
    %c0_i32_1 = arith.constant 0 : i32
    return %c0_i32, %c0_i32_0 : i32, i32
  }
  func.func @transform_2(%arg0: i32) -> (i32, i32, i32) {
    %c0_i32 = arith.constant 0 : i32
    %c0_i32_0 = arith.constant 0 : i32
    %c0_i32_1 = arith.constant 0 : i32
    return %arg0, %c0_i32, %c0_i32_0 : i32, i32, i32
  }
}

</mosaic_0001>

<bundles_post_ra>
// kernel: tpu_custom_call.1
= control target key start
LH: loop header
LB: loop body
LE: loop exit
PB: predicated region body
PF: predicated region fallthrough
CT: control target
= control target key end

     0   :  { %7 = vsyncpa [#allocation3], 0  ;;  %s1575_s0 = inlined_call_operand.hbm [shape: f32[8,4,64], index: 0, kind: input, shape index: {}]   ;;  %s1576_s1 = inlined_call_operand.hbm [shape: f32[64,256], index: 1, kind: input, shape index: {}]   ;;  %s1577_s2 = inlined_call_operand.hbm [shape: f32[8,8,256], index: 2, kind: output, shape index: {}]  }
   0x1   :  { %9 = vsyncpa [#allocation3 + $0x1], 0 }
   0x2   :  { %10 = vsyncpa [#allocation6], 0 }
   0x3   :  { %11 = vsyncpa [#allocation4], 0 }
   0x4   :  { %13 = vsyncpa [#allocation4 + $0x1], 0  ;;  %s1208_s9 = smov 0   ;;  %s1210_s10 = smov 0  }
   0x5   :  { %s1212_s11 = smov 0   ;;  %s1214_s12 = smov 0  }
   0x6 LB: > { %s1229_s13 = sadd.s32 4294967295, %s1180_s12   ;;  %s868_s14 = sadd.s32 4294967294, %s1180_s12   ;;  %s1180_s12 = sphi %s1214_s12, %s1599_s12   ;;  %s1176_s11 = sphi %s1212_s11, %s1598_s11   ;;  %s1172_s10 = sphi %s1210_s10, %s1597_s10   ;;  %s1168_s9 = sphi %s1208_s9, %s1596_s9  }
   0x7   : > { %p39_p0 = scmp.ne.s32.totalorder %s1172_s10, %s1168_s9  ;;  %p1578_p1 = scmp.eq.s32.totalorder %s1229_s13, 0 }
   0x8   : > { %p90_p3 = scmp.eq.s32.totalorder %s868_s14, 1  ;;  %p869_p5 = scmp.ge.s32.totalorder %s1180_s12, 1 }
   0x9   : > { %p1238_p4 = por %p1578_p1, %p39_p0  ;;  %p97_p7 = scmp.lt.s32.totalorder %s1180_s12, 3 }
   0xa   : > { %p1243_p6 = por %p90_p3, %p39_p0  ;;  %s1182_s18 = smov [#allocation5]  }
   0xb   : > { %s1581_s15 = scalar_select %p1238_p4, 1, 0 }
   0xc   : > { %s1582_s16 = scalar_select %p1243_p6, 1, 0 }
   0xd   : > { %p1248_p8 = pnand %p869_p5, %p97_p7  ;;  %s109_s19 = sshll.u32 %s1182_s18, 4  ;;  %s1252_s19 = int_to_ptr.vmem [resolvable:$true] %s109_s19 }
   0xe   : > { %s1264_s21 = sadd.s32 1, %s1180_s12   ;;  %s26_s22 = sadd.s32 1, %s1176_s11 }
   0xf   : > { %s1583_s17 = scalar_select %p1248_p8, 1, 0 }
  0x10   : > { %p995_p9 = pneg %p1248_p8  ;;  %s23_s23 = ssub.s32 %s1180_s12, %s1264_s21 }
  0x11   : > { %s1052_s26 = scalar_lea.hbm %s1576_s1, 2048 }
  0x12   : > { %p1259_p11 = pnand %p995_p9, %p1578_p1  ;;  %p1053_p12 = scmp.ne.s32.totalorder %s1576_s1, %s1052_s26 }
  0x13   : > { %p1059_p5 = scmp.lt.u32.totalorder %s1052_s26, %s1576_s1 }
  0x14   : > { %p1054_p13 = pneg %p1259_p11 }
  0x16   : > { %p1055_p0 = pnand %p1054_p13, %p1053_p12 }
  0x18   : > { %p1056_p3 = pneg %p1055_p0 }
  0x1a   : > { %p1061_p7 = pnand %p1059_p5, %p1056_p3 }
  0x1c   : > { %1064 = shalt.err (!%p1061_p7)
}
  0x1d   : > { %s1065_s3 = scalar_lea.vmem %s1252_s19, 2048  ;;  %p1073_p2 = scmp.lt.s32.totalorder %s1252_s19, %s1252_s19 }
  0x1e   : > { %p1066_p9 = scmp.ne.s32.totalorder %s1252_s19, %s1065_s3  ;;  %p1074_p6 = scmp.lt.s32.totalorder %s1065_s3, %s1065_s3 }
  0x20   : > { %p1068_p10 = pnand %p1066_p9, %p1054_p13  ;;  %p1075_p4 = por %p1074_p6, %p1073_p2 }
  0x22   : > { %p1069_p1 = pneg %p1068_p10 }
  0x24   : > { %p1076_p8 = pnand %p1075_p4, %p1069_p1 }
  0x26   : > { %1079 = shalt.err (!%p1076_p8)
}
  0x27   : > { %s1183_s4 = smov 256   ;;  %s1184_s5 = smov 16  }
  0x28   : > { %998 = dma.hbm_to_vmem [thread:$0]  (!%p1259_p11), %s1576_s1, 2048, %s1252_s19, [#allocation6], %s1183_s4, %s1183_s4, %s1184_s5  }
  0x29   : > { %p24_p2 = scmp.eq.s32.totalorder %s23_s23, 0  ;;  %p33_p1 = scmp.ne.s32.totalorder %s1176_s11, %s1172_s10 }
  0x2a   : > { %p34_p4 = scmp.eq.s32.totalorder %s1180_s12, 0  ;;  %p1008_p6 = scmp.lt.s32.totalorder %s1180_s12, 2 }
  0x2b   : > { %s1295_s8 = scalar_select %p24_p2, %s1176_s11, %s26_s22  }
  0x2c   : > { %p35_p8 = por %p34_p4, %p33_p1  ;;  %p1585_p10 = scmp.eq.s32.totalorder %s1229_s13, 1 }
  0x2d   : > { %s123_s18 = sand.u32 1, %s1176_s11   ;;  %s920_s24 = sshll.u32 %s1180_s12, 8 }
  0x2e   : > { %p1299_p12 = por %p1585_p10, %p33_p1  ;;  %s872_s25 = sshll.u32 %s123_s18, 4 }
  0x2f   : > { %s1308_s27 = scalar_lea.hbm %s1575_s0, %s920_s24  ;;  %s127_s19 = scalar_lea.vmem [#allocation2], %s872_s25 }
  0x30   : > { %s134_s22 = sshll.u32 %s127_s19, 4  ;;  %p1310_p11 = pnand %p1008_p6, %p35_p8  ;;  %s1314_s22 = int_to_ptr.vmem [resolvable:$true] %s134_s22 }
  0x31   : > { %s1316_s28 = scalar_lea.sflag [#allocation3], %s123_s18  ;;  %s1080_s29 = scalar_lea.hbm %s1308_s27, 256 }
  0x32   : > { %p1081_p13 = scmp.ne.s32.totalorder %s1308_s27, %s1080_s29  ;;  %p1082_p0 = pneg %p1310_p11 }
  0x33   : > { %s1085_s4 = scalar_lea.hbm %s1575_s0, 512  ;;  %p1086_p7 = scmp.lt.u32.totalorder %s1308_s27, %s1575_s0 }
  0x34   : > { %p1083_p3 = pnand %p1082_p0, %p1081_p13  ;;  %p1087_p9 = scmp.lt.u32.totalorder %s1085_s4, %s1080_s29 }
  0x35   : > { %p1089_p1 = scmp.lt.u32.totalorder %s1080_s29, %s1308_s27 }
  0x36   : > { %p1084_p5 = pneg %p1083_p3  ;;  %p1088_p2 = por %p1087_p9, %p1086_p7 }
  0x38   : > { %p1090_p4 = por %p1089_p1, %p1088_p2 }
  0x3a   : > { %p1091_p6 = pnand %p1090_p4, %p1084_p5 }
  0x3c   : > { %1094 = shalt.err (!%p1091_p6)
}
  0x3d   : > { %s1095_s7 = scalar_lea.vmem %s1314_s22, 256  ;;  %s1185_s18 = smov [#allocation2]  }
  0x3e   : > { %p1096_p8 = scmp.ne.s32.totalorder %s1314_s22, %s1095_s7  ;;  %s1100_s24 = sshll.u32 %s1185_s18, 4  ;;  %s1101_s24 = int_to_ptr.vmem [resolvable:$false] %s1100_s24 }
  0x3f   : > { %s1102_s25 = scalar_lea.vmem %s1101_s24, 512  ;;  %p1103_p3 = scmp.lt.s32.totalorder %s1314_s22, %s1101_s24 }
  0x40   : > { %p1098_p10 = pnand %p1096_p8, %p1082_p0  ;;  %p1104_p7 = scmp.lt.s32.totalorder %s1102_s25, %s1095_s7 }
  0x42   : > { %p1099_p13 = pneg %p1098_p10  ;;  %p1105_p9 = por %p1104_p7, %p1103_p3 }
  0x44   : > { %p1106_p2 = pnand %p1105_p9, %p1099_p13 }
  0x46   : > { %1109 = shalt.err (!%p1106_p2)
}
  0x47   : > { %s1186_s20 = smov 64   ;;  %s1187_s26 = smov 4  }
  0x48   : > { %1002 = dma.hbm_to_vmem [thread:$0]  (!%p1310_p11), %s1308_s27, 256, %s1314_s22, %s1316_s28, %s1186_s20, %s1186_s20, %s1187_s26  }
  0x49   : > { %p1588_p0 = scmp.ne.s32.totalorder %s1583_s17, 0 }
  0x4a   : > { %s1347_s19 = sand.u32 (!%p1588_p0), 1, %s1172_s10   ;;  %p1589_p5 = scmp.ne.s32.totalorder (!%p1588_p0), %s1581_s15, 0 }
  0x4b   : > { %146 = sbr.rel (%p1588_p0) target bundleno = 362 (0x16a), region = 28  ;;  %s876_s29 = sshll.u32 (!%p1588_p0), %s1347_s19, 4 }
  0x4c   : > { %s149_s30 = scalar_lea.sflag (!%p1588_p0), [#allocation3], %s1347_s19  ;;  %s1351_s3 = scalar_lea.vmem (!%p1588_p0), [#allocation2], %s876_s29 }
  0x52   : > { %1155 = dma.done.wait (%p1589_p5), %s149_s30, 256  }
  0x53   : > { %1157 = vsyncadd (%p1589_p5), %s149_s30, 4294967040  ;;  %p1590_p11 = scmp.eq.s32.totalorder %s1229_s13, 0 }
  0x55   : > { %1159 = dma.done.wait (%p1590_p11), [#allocation6], 2048   ;;  %p1591_p1 = pmov %p1590_p11 }
  0x56   : > { %v1188_v0 = vmov 0.0   ;;  %v180_v1 = vld [vmem:[#allocation5 + $0x8] sm:$0xff]  ;;  %v182_v2 = vld [vmem:[#allocation5 + $0x18] sm:$0xff]  ;;  %v179_v3 = vld [vmem:[#allocation5] sm:$0xff]  ;;  %vm204_vm0 = vcmask 1041409   ;;  %vm207_vm1 = vcmask 1042434  }
  0x57   : > { %1161 = vsyncadd (%p1591_p1), [#allocation6], 4294965248  ;;  %279 = vmatprep.mubr.f32.mxu0 %v1188_v0  ;;  %424 = vmatprep.mubr.f32.mxu1 %v1188_v0  ;;  %v923_v4 = vpack.c.bf16 %v182_v2, %v180_v1  ;;  %v181_v5 = vld [vmem:[#allocation5 + $0x10] sm:$0xff]  ;;  %v184_v6 = vld [vmem:[#allocation5 + $0x28] sm:$0xff]  ;;  %vm210_vm2 = vcmask 1043459   ;;  %vm212_vm3 = vcmask 523264  }
  0x58   : > { %v186_v7 = vld [vmem:[#allocation5 + $0x38] sm:$0xff]  ;;  %v1363_v8 = vpack.c.bf16 %v181_v5, %v179_v3  ;;  %v183_v10 = vld [vmem:[#allocation5 + $0x20] sm:$0xff]  ;;  %v185_v11 = vld [vmem:[#allocation5 + $0x30] sm:$0xff]  ;;  %v1189_v1 = vmov 1966171168   ;;  %v292_v3 = vlaneseq  ;;  %s878_s15 = sshll.u32 %s1347_s19, 6 }
  0x59   : > { %v1365_v9 = vpack.c.bf16 %v186_v7, %v184_v6  ;;  %v188_v12 = vld [vmem:[#allocation5 + $0x48] sm:$0xff]  ;;  %924 = vmatprep.subr.bf16.mxu0 %v923_v4  ;;  %940 = vmatprep.subr.bf16.mxu1 %v923_v4  ;;  %v190_v13 = vld [vmem:[#allocation5 + $0x58] sm:$0xff]  ;;  %v1369_v14 = vpack.c.bf16 %v185_v11, %v183_v10  ;;  %v187_v16 = vld [vmem:[#allocation5 + $0x40] sm:$0xff]  ;;  %v290_v2 = vunpack.c.l.s4 %v1189_v1  ;;  %s1426_s17 = scalar_lea.vmem [#allocation7], %s878_s15  ;;  %s922_s27 = sshll.u32 %s1229_s13, 10 }
  0x5a   : > { %926 = vmatpush1.bf16.msra.mxu0 %v1363_v8  ;;  %942 = vmatpush1.bf16.msra.mxu1 %v1363_v8  ;;  %v1373_v15 = vpack.c.bf16 %v190_v13, %v188_v12  ;;  %v189_v17 = vld [vmem:[#allocation5 + $0x50] sm:$0xff]  ;;  %v192_v19 = vld [vmem:[#allocation5 + $0x68] sm:$0xff]  ;;  %v194_v20 = vld [vmem:[#allocation5 + $0x78] sm:$0xff]  ;;  %v293_v5 = vshrl.u32 %v292_v3, 7  ;;  %vm1422_vm4 = vcmp.lt.s32.totalorder %v292_v3, 256  ;;  %s785_s22 = sshll.u32 %s1426_s17, 4  ;;  %s1493_s28 = scalar_lea.hbm %s1577_s2, %s922_s27  ;;  %s1495_s22 = int_to_ptr.vmem [resolvable:$true] %s785_s22 }
  0x5b   : > { %928 = vmatprep.subr.bf16.mxu0 %v1365_v9  ;;  %944 = vmatprep.subr.bf16.mxu1 %v1365_v9  ;;  %v196_v18 = vld [vmem:[%s1351_s3 + $0x4] sm:$0x1]  ;;  %v197_v21 = vld [vmem:[%s1351_s3 + $0x8] sm:$0x1]  ;;  %v195_v23 = vld [vmem:[%s1351_s3] sm:$0x1]  ;;  %v933_v26 = vpack.c.bf16 %v189_v17, %v187_v16  ;;  %v935_v31 = vpack.c.bf16 %v194_v20, %v192_v19 }
  0x5c   : > { %v203_v22 = vrot.slane %v196_v18, 7  ;;  %v344_v24 = vld [vmem:[%s1351_s3 + $0x1] sm:$0x1]  ;;  %v345_v25 = vld [vmem:[%s1351_s3 + $0x5] sm:$0x1]  ;;  %v206_v33 = vrot.slane %v197_v21, 6 }
  0x5d   : > { %v191_v27 = vld [vmem:[#allocation5 + $0x60] sm:$0xff]  ;;  %v193_v28 = vld [vmem:[#allocation5 + $0x70] sm:$0xff]  ;;  %v346_v29 = vld [vmem:[%s1351_s3 + $0x9] sm:$0x1]  ;;  %v352_v30 = vrot.slane %v345_v25, 7  ;;  %s771_s4 = scalar_lea.sflag [#allocation4], %s1347_s19 }
  0x5e   : > { %930 = vmatpush1.bf16.msra.mxu0 %v1369_v14  ;;  %946 = vmatpush1.bf16.msra.mxu1 %v1369_v14  ;;  %v198_v32 = vld [vmem:[%s1351_s3 + $0xc] sm:$0x1]  ;;  %v347_v34 = vld [vmem:[%s1351_s3 + $0xd] sm:$0x1]  ;;  %v354_v35 = vrot.slane %v346_v29, 6  ;;  %v205_v36 = vsel %vm204_vm0, %v203_v22, %v195_v23  ;;  %v937_v38 = vpack.c.bf16 %v193_v28, %v191_v27  ;;  %s1110_s5 = scalar_lea.vmem %s1495_s22, 1024 }
  0x5f   : > { %932 = vmatprep.subr.bf16.mxu0 %v1373_v15  ;;  %948 = vmatprep.subr.bf16.mxu1 %v1373_v15  ;;  %v353_v37 = vsel %vm204_vm0, %v352_v30, %v344_v24  ;;  %v209_v39 = vrot.slane %v198_v32, 5  ;;  %v356_v40 = vrot.slane %v347_v34, 5  ;;  %v208_v41 = vsel %vm207_vm1, %v206_v33, %v205_v36  ;;  %v487_v45 = vld [vmem:[%s1351_s3 + $0x6] sm:$0x1]  ;;  %v629_v46 = vld [vmem:[%s1351_s3 + $0x7] sm:$0x1]  ;;  %p1111_p4 = scmp.ne.s32.totalorder %s1495_s22, %s1110_s5 }
  0x60   : > { %v355_v42 = vsel %vm207_vm1, %v354_v35, %v353_v37  ;;  %v488_v47 = vld [vmem:[%s1351_s3 + $0xa] sm:$0x1]  ;;  %v494_v48 = vrot.slane %v487_v45, 7  ;;  %v630_v49 = vld [vmem:[%s1351_s3 + $0xb] sm:$0x1]  ;;  %v636_v50 = vrot.slane %v629_v46, 7 }
  0x61   : > { %v211_v43 = vsel %vm210_vm2, %v209_v39, %v208_v41  ;;  %v357_v44 = vsel %vm210_vm2, %v356_v40, %v355_v42  ;;  %v486_v51 = vld [vmem:[%s1351_s3 + $0x2] sm:$0x1]  ;;  %v628_v52 = vld [vmem:[%s1351_s3 + $0x3] sm:$0x1]  ;;  %v489_v53 = vld [vmem:[%s1351_s3 + $0xe] sm:$0x1]  ;;  %p1112_p6 = pnand %p1111_p4, %p1299_p12 }
  0x62   : > { %934 = vmatpush1.bf16.msra.mxu0 %v933_v26  ;;  %950 = vmatpush1.bf16.msra.mxu1 %v933_v26  ;;  %v496_v54 = vrot.slane %v488_v47, 6  ;;  %v631_v55 = vld [vmem:[%s1351_s3 + $0xf] sm:$0x1]  ;;  %v638_v56 = vrot.slane %v630_v49, 6  ;;  %v495_v57 = vsel %vm204_vm0, %v494_v48, %v486_v51  ;;  %v637_v58 = vsel %vm204_vm0, %v636_v50, %v628_v52  ;;  %s1190_s6 = smov [#allocation7]  }
  0x63   : > { %936 = vmatprep.subr.bf16.mxu0 %v935_v31  ;;  %952 = vmatprep.subr.bf16.mxu1 %v935_v31  ;;  %v498_v59 = vrot.slane %v489_v53, 5  ;;  %v640_v60 = vrot.slane %v631_v55, 5  ;;  %p1113_p8 = pneg %p1112_p6  ;;  %s1114_s7 = sshll.u32 %s1190_s6, 4  ;;  %s1115_s7 = int_to_ptr.vmem [resolvable:$false] %s1114_s7 }
  0x64   : > { %v497_v61 = vsel %vm207_vm1, %v496_v54, %v495_v57  ;;  %v639_v62 = vsel %vm207_vm1, %v638_v56, %v637_v58  ;;  %s1116_s18 = scalar_lea.vmem %s1115_s7, 2048  ;;  %p1117_p10 = scmp.lt.s32.totalorder %s1495_s22, %s1115_s7 }
  0x65   : > { %v499_v63 = vsel %vm210_vm2, %v498_v59, %v497_v61  ;;  %p1118_p13 = scmp.lt.s32.totalorder %s1116_s18, %s1110_s5 }
  0x66   : > { %938 = vmatpush1.bf16.msra.mxu0 %v937_v38  ;;  %954 = vmatpush1.bf16.msra.mxu1 %v937_v38 }
  0x67   : > { %956 = vmatprep.subr.bf16.mxu0 %v923_v4  ;;  %972 = vmatprep.subr.bf16.mxu1 %v923_v4  ;;  %v291_v4 = vunpack.c.0.s8 %v290_v2  ;;  %p1119_p3 = por %p1118_p13, %p1117_p10 }
  0x69   : > { %879 = vmatmul.mubr.msk.f32.vlgmr.msra.gmra.mrb[0].mxu0 %vm212_vm3, %v211_v43  ;;  %887 = vmatmul.mubr.msk.f32.vlgmr.msra.gmra.mrb[0].mxu1 %vm212_vm3, %v357_v44  ;;  %p1120_p7 = pnand %p1119_p3, %p1113_p8 }
  0x6a   : > { %958 = vmatpush1.bf16.msra.mxu0 %v1363_v8  ;;  %974 = vmatpush1.bf16.msra.mxu1 %v1363_v8  ;;  %v294_v8 = vsub.s32 %v291_v4, %v293_v5 }
  0x6b   : > { %960 = vmatprep.subr.bf16.mxu0 %v1365_v9  ;;  %976 = vmatprep.subr.bf16.mxu1 %v1365_v9 }
  0x6c   : > { %566 = vmatprep.mubr.f32.mxu0 %v1188_v0  ;;  %708 = vmatprep.mubr.f32.mxu1 %v1188_v0  ;;  %v641_v0 = vsel %vm210_vm2, %v640_v60, %v639_v62 }
  0x6e   : > { %962 = vmatpush1.bf16.msra.mxu0 %v1369_v14  ;;  %978 = vmatpush1.bf16.msra.mxu1 %v1369_v14 }
  0x6f   : > { %964 = vmatprep.subr.bf16.mxu0 %v1373_v15  ;;  %980 = vmatprep.subr.bf16.mxu1 %v1373_v15 }
  0x72   : > { %966 = vmatpush1.bf16.msra.mxu0 %v933_v26  ;;  %982 = vmatpush1.bf16.msra.mxu1 %v933_v26 }
  0x73   : > { %968 = vmatprep.subr.bf16.mxu0 %v935_v31  ;;  %984 = vmatprep.subr.bf16.mxu1 %v935_v31 }
  0x76   : > { %970 = vmatpush1.bf16.msra.mxu0 %v937_v38  ;;  %986 = vmatpush1.bf16.msra.mxu1 %v937_v38 }
  0x79   : > { %896 = vmatmul.mubr.msk.f32.vlgmr.msra.gmra.mrb[2].mxu0 %vm212_vm3, %v499_v63  ;;  %905 = vmatmul.mubr.msk.f32.vlgmr.msra.gmra.mrb[2].mxu1 %vm212_vm3, %v641_v0 }
 0x13c   : > { %v281_v6 = vpop.f32.mrb[0].mxu0  ;;  %v426_v7 = vpop.f32.mrb[0].mxu1 }
 0x13d   : > { %v283_v9 = vpop.f32.mrb[1].mxu0  ;;  %v428_v10 = vpop.f32.mrb[1].mxu1 }
 0x13e   : > { %v288_v11 = vcombine.low %v281_v6, %v283_v9  ;;  %v433_v12 = vcombine.low %v426_v7, %v428_v10 }
 0x140   : > { %v295_v13 = vrot.slane %v288_v11, %v294_v8  ;;  %v440_v14 = vrot.slane %v433_v12, %v294_v8 }
 0x142   : > { %v296_v16 = vcombine.high %v295_v13, %v295_v13  ;;  %v303_v17 = vrot.slane %v295_v13, %v294_v8  ;;  %v441_v18 = vcombine.high %v440_v14, %v440_v14  ;;  %v448_v19 = vrot.slane %v440_v14, %v294_v8 }
 0x144   : > { %v310_v20 = vrot.slane %v296_v16, %v294_v8  ;;  %v311_v21 = vcombine.high %v303_v17, %v303_v17  ;;  %321 = vst.msk [vmem:[%s1426_s17] ss:$8 sm:$0x3] %vm1422_vm4, %v303_v17  ;;  %883 = vst.msk [vmem:[%s1426_s17 + $0x1] ss:$8 sm:$0x3] %vm1422_vm4, %v303_v17  ;;  %v455_v22 = vrot.slane %v441_v18, %v294_v8 }
 0x145   : > { %v456_v23 = vcombine.high %v448_v19, %v448_v19  ;;  %888 = vst.msk [vmem:[%s1426_s17 + $0x2] ss:$8 sm:$0x3] %vm1422_vm4, %v448_v19  ;;  %892 = vst.msk [vmem:[%s1426_s17 + $0x3] ss:$8 sm:$0x3] %vm1422_vm4, %v448_v19 }
 0x146   : > { %v312_v24 = vcombine.high %v310_v20, %v310_v20  ;;  %880 = vst.msk [vmem:[%s1426_s17 + $0x10] ss:$8 sm:$0x3] %vm1422_vm4, %v310_v20  ;;  %881 = vst.msk [vmem:[%s1426_s17 + $0x20] ss:$8 sm:$0x3] %vm1422_vm4, %v311_v21  ;;  %v457_v25 = vcombine.high %v455_v22, %v455_v22 }
 0x147   : > { %884 = vst.msk [vmem:[%s1426_s17 + $0x11] ss:$8 sm:$0x3] %vm1422_vm4, %v310_v20  ;;  %885 = vst.msk [vmem:[%s1426_s17 + $0x21] ss:$8 sm:$0x3] %vm1422_vm4, %v311_v21 }
 0x148   : > { %889 = vst.msk [vmem:[%s1426_s17 + $0x12] ss:$8 sm:$0x3] %vm1422_vm4, %v455_v22  ;;  %890 = vst.msk [vmem:[%s1426_s17 + $0x22] ss:$8 sm:$0x3] %vm1422_vm4, %v456_v23 }
 0x149   : > { %893 = vst.msk [vmem:[%s1426_s17 + $0x13] ss:$8 sm:$0x3] %vm1422_vm4, %v455_v22  ;;  %894 = vst.msk [vmem:[%s1426_s17 + $0x23] ss:$8 sm:$0x3] %vm1422_vm4, %v456_v23 }
 0x14a   : > { %882 = vst.msk [vmem:[%s1426_s17 + $0x30] ss:$8 sm:$0x3] %vm1422_vm4, %v312_v24  ;;  %886 = vst.msk [vmem:[%s1426_s17 + $0x31] ss:$8 sm:$0x3] %vm1422_vm4, %v312_v24 }
 0x14b   : > { %891 = vst.msk [vmem:[%s1426_s17 + $0x32] ss:$8 sm:$0x3] %vm1422_vm4, %v457_v25  ;;  %895 = vst.msk [vmem:[%s1426_s17 + $0x33] ss:$8 sm:$0x3] %vm1422_vm4, %v457_v25 }
 0x14c   : > { %v568_v26 = vpop.f32.mrb[2].mxu0  ;;  %v710_v27 = vpop.f32.mrb[2].mxu1 }
 0x14d   : > { %v570_v28 = vpop.f32.mrb[3].mxu0  ;;  %v712_v29 = vpop.f32.mrb[3].mxu1 }
 0x14e   : > { %v575_v30 = vcombine.low %v568_v26, %v570_v28  ;;  %v717_v31 = vcombine.low %v710_v27, %v712_v29 }
 0x150   : > { %v582_v32 = vrot.slane %v575_v30, %v294_v8  ;;  %v724_v33 = vrot.slane %v717_v31, %v294_v8 }
 0x152   : > { %v583_v34 = vcombine.high %v582_v32, %v582_v32  ;;  %v590_v35 = vrot.slane %v582_v32, %v294_v8  ;;  %v725_v36 = vcombine.high %v724_v33, %v724_v33  ;;  %v732_v37 = vrot.slane %v724_v33, %v294_v8 }
 0x154   : > { %v597_v38 = vrot.slane %v583_v34, %v294_v8  ;;  %v598_v39 = vcombine.high %v590_v35, %v590_v35  ;;  %897 = vst.msk [vmem:[%s1426_s17 + $0x4] ss:$8 sm:$0x3] %vm1422_vm4, %v590_v35  ;;  %901 = vst.msk [vmem:[%s1426_s17 + $0x5] ss:$8 sm:$0x3] %vm1422_vm4, %v590_v35  ;;  %v739_v40 = vrot.slane %v725_v36, %v294_v8 }
 0x155   : > { %v740_v41 = vcombine.high %v732_v37, %v732_v37  ;;  %906 = vst.msk [vmem:[%s1426_s17 + $0x6] ss:$8 sm:$0x3] %vm1422_vm4, %v732_v37  ;;  %910 = vst.msk [vmem:[%s1426_s17 + $0x7] ss:$8 sm:$0x3] %vm1422_vm4, %v732_v37 }
 0x156   : > { %v599_v42 = vcombine.high %v597_v38, %v597_v38  ;;  %898 = vst.msk [vmem:[%s1426_s17 + $0x14] ss:$8 sm:$0x3] %vm1422_vm4, %v597_v38  ;;  %899 = vst.msk [vmem:[%s1426_s17 + $0x24] ss:$8 sm:$0x3] %vm1422_vm4, %v598_v39  ;;  %v741_v43 = vcombine.high %v739_v40, %v739_v40 }
 0x157   : > { %902 = vst.msk [vmem:[%s1426_s17 + $0x15] ss:$8 sm:$0x3] %vm1422_vm4, %v597_v38  ;;  %903 = vst.msk [vmem:[%s1426_s17 + $0x25] ss:$8 sm:$0x3] %vm1422_vm4, %v598_v39 }
 0x158   : > { %907 = vst.msk [vmem:[%s1426_s17 + $0x16] ss:$8 sm:$0x3] %vm1422_vm4, %v739_v40  ;;  %908 = vst.msk [vmem:[%s1426_s17 + $0x26] ss:$8 sm:$0x3] %vm1422_vm4, %v740_v41 }
 0x159   : > { %911 = vst.msk [vmem:[%s1426_s17 + $0x17] ss:$8 sm:$0x3] %vm1422_vm4, %v739_v40  ;;  %912 = vst.msk [vmem:[%s1426_s17 + $0x27] ss:$8 sm:$0x3] %vm1422_vm4, %v740_v41 }
 0x15a   : > { %900 = vst.msk [vmem:[%s1426_s17 + $0x34] ss:$8 sm:$0x3] %vm1422_vm4, %v599_v42  ;;  %904 = vst.msk [vmem:[%s1426_s17 + $0x35] ss:$8 sm:$0x3] %vm1422_vm4, %v599_v42 }
 0x15b   : > { %909 = vst.msk [vmem:[%s1426_s17 + $0x36] ss:$8 sm:$0x3] %vm1422_vm4, %v741_v43  ;;  %913 = vst.msk [vmem:[%s1426_s17 + $0x37] ss:$8 sm:$0x3] %vm1422_vm4, %v741_v43 }
 0x15c   : > { %1123 = shalt.err (!%p1120_p7)
}
 0x15d   : > { %s1124_s24 = scalar_lea.hbm %s1493_s28, 1024  ;;  %s1128_s26 = scalar_lea.hbm %s1577_s2, 2048 }
 0x15e   : > { %p1125_p9 = scmp.ne.s32.totalorder %s1493_s28, %s1124_s24  ;;  %p1129_p5 = scmp.lt.u32.totalorder %s1493_s28, %s1577_s2 }
 0x15f   : > { %p1130_p11 = scmp.lt.u32.totalorder %s1128_s26, %s1124_s24  ;;  %p1132_p4 = scmp.lt.u32.totalorder %s1124_s24, %s1493_s28 }
 0x160   : > { %p1126_p2 = pnand %p1125_p9, %p1299_p12 }
 0x161   : > { %p1131_p1 = por %p1130_p11, %p1129_p5 }
 0x162   : > { %p1127_p0 = pneg %p1126_p2 }
 0x163   : > { %p1133_p6 = por %p1132_p4, %p1131_p1 }
 0x165   : > { %p1134_p8 = pnand %p1133_p6, %p1127_p0 }
 0x167   : > { %1137 = shalt.err (!%p1134_p8)
}
 0x168   : > { %s1191_s3 = smov 256   ;;  %s1192_s15 = smov 16  }
 0x169   : > { %993 = dma.vmem_to_hbm [thread:$0]  (%p1299_p12), %s1495_s22, 1024, %s1493_s28, %s771_s4, %s1191_s3, %s1191_s3, %s1192_s15  }
 0x16a PF: > { %s800_s17 = sand.u32 1, %s1168_s9   ;;  %p1594_p10 = scmp.ne.s32.totalorder %s1582_s16, 0 }
 0x16b   : > { %p1595_p13 = scmp.ge.s32.totalorder %s1180_s12, 2  ;;  %s801_s27 = scalar_lea.sflag [#allocation4], %s800_s17 }
 0x16d   : > { %p1004_p3 = pnand %p1595_p13, %p1594_p10 }
 0x16f   : > { %1163 = dma.done.wait (!%p1004_p3), %s801_s27, 1024  }
 0x170   : > { %1165 = vsyncadd (!%p1004_p3), %s801_s27, 4294966272  ;;  %p16_p7 = scmp.ge.s32.totalorder %s1264_s21, 4   ;;  %s1596_s9 = smov %s1172_s10 }
 0x171   : > { %s1597_s10 = smov %s1176_s11  ;;  %s1598_s11 = smov %s1295_s8 }
 0x172   : > { %s1599_s12 = smov %s1264_s21  ;;  %18 = sbr.rel (!%p16_p7) target bundleno = 6 (0x6), region = 108 }
 0x179   :  { %806 = vsyncpa [#allocation3], 1 }
 0x17a   :  { %808 = vsyncpa [#allocation3 + $0x1], 1 }
 0x17b   :  { %809 = vsyncpa [#allocation6], 1 }
 0x17c   :  { %810 = vsyncpa [#allocation4], 1 }
 0x17d   :  { %812 = vsyncpa [#allocation4 + $0x1], 1 }

</bundles_post_ra>
